<compile_context>
chip_gen: v7x
topology: tpu7x:2x2x1
jax: 0.10.0
libtpu: 0.0.40
codegen_flags: <defaults>
</compile_context>

<pallas_src>
import functools

import jax
import jax.numpy as jnp
from jax.experimental import pallas as pl
from jax.experimental.pallas import tpu as pltpu  # noqa: F401  (not required for this tiny single-block kernel)

HIDDEN = 128
H2 = 2 * HIDDEN  # fused twin hidden width (256)


def _make_kernel(state_dim):
    # Static row offsets into the packed "main" parameter buffer.
    off_w2 = 0                      # [256, 256] block-diagonal layer-2 weight
    off_w1s = H2                    # [state_dim, 256] layer-1 weight (state rows)
    off_w1a = H2 + state_dim        # [1, 256] layer-1 weight (action row)
    off_b1 = H2 + state_dim + 1     # [1, 256] fused bias 1
    off_b2 = H2 + state_dim + 2     # [1, 256] fused bias 2

    def kernel(state_ref, action_ref, wmain_ref, whead_ref, q_ref):
        s = state_ref[...]                                   # [B, state_dim]
        a = action_ref[...]                                  # [B, 1]

        w1s = wmain_ref[off_w1s:off_w1s + state_dim, :]      # [state_dim, 256]
        w1a = wmain_ref[off_w1a:off_w1a + 1, :]              # [1, 256]
        b1 = wmain_ref[off_b1:off_b1 + 1, :]                 # [1, 256]
        w2 = wmain_ref[off_w2:off_w2 + H2, :]                # [256, 256]
        b2 = wmain_ref[off_b2:off_b2 + 1, :]                 # [1, 256]
        w3 = whead_ref[0:H2, :]                              # [256, 2]
        b3 = whead_ref[H2:H2 + 1, :]                         # [1, 2]

        # Layer 1 (both twins at once): state matmul + broadcast action term.
        h = jnp.dot(s, w1s, preferred_element_type=jnp.float32)
        h = jnp.maximum(h + a * w1a + b1, 0.0)
        # Layer 2: block-diagonal fused matmul.
        h = jnp.maximum(jnp.dot(h, w2, preferred_element_type=jnp.float32) + b2, 0.0)
        # Layer 3: [B, 2] output, lane 0 = q1, lane 1 = q2.
        q_ref[...] = jnp.dot(h, w3, preferred_element_type=jnp.float32) + b3

    return kernel


def _full_spec(shape):
    return pl.BlockSpec(shape, lambda: tuple(0 for _ in shape))


@jax.jit
def critic_forward(state, action, w_main, w_head):
    """Twin-Q forward. state: [B, state_dim] f32, action: [B, 1] f32."""
    B, state_dim = state.shape
    kernel = _make_kernel(state_dim)

    q = pl.pallas_call(
        kernel,
        out_shape=jax.ShapeDtypeStruct((B, 2), jnp.float32),
        in_specs=[_full_spec(state.shape),
                  _full_spec(action.shape),
                  _full_spec(w_main.shape),
                  _full_spec(w_head.shape)],
        out_specs=_full_spec((B, 2)),
    )(state, action, w_main, w_head)

    return q[:, 0:1], q[:, 1:2]


def init_linear(key, fan_in, fan_out):
    """Mimic torch.nn.Linear default init: U(-1/sqrt(fan_in), 1/sqrt(fan_in))."""
    kw, kb = jax.random.split(key)
    bound = 1.0 / jnp.sqrt(float(fan_in))
    w = jax.random.uniform(kw, (fan_in, fan_out), jnp.float32, -bound, bound)
    b = jax.random.uniform(kb, (1, fan_out), jnp.float32, -bound, bound)
    return w, b


def init_critic_params(key, state_dim, hidden=HIDDEN):
    d_in = state_dim + 1  # state_dim + 1 action column (matches the torch module)
    keys = jax.random.split(key, 6)
    params1 = init_linear(keys[0], d_in, hidden) + init_linear(keys[1], hidden, hidden) \
        + init_linear(keys[2], hidden, 1)
    params2 = init_linear(keys[3], d_in, hidden) + init_linear(keys[4], hidden, hidden) \
        + init_linear(keys[5], hidden, 1)
    return params1, params2


def pack_critic_params(params1, params2, state_dim, hidden=HIDDEN):
    """Pack both twins' parameters into two flat f32 buffers (done once, on host)."""
    w1a, b1a, w2a, b2a, w3a, b3a = params1
    w1b, b1b, w2b, b2b, w3b, b3b = params2
    h2 = 2 * hidden

    # Fused layer 1: [state_dim+1, 2H], then split state rows / action row.
    w1_f = jnp.concatenate([w1a, w1b], axis=1)
    w1s = w1_f[:state_dim, :]
    w1act = w1_f[state_dim:state_dim + 1, :]
    b1_f = jnp.concatenate([b1a, b1b], axis=1)

    # Block-diagonal fused layer 2: [2H, 2H].
    w2_bd = jnp.zeros((h2, h2), jnp.float32)
    w2_bd = w2_bd.at[:hidden, :hidden].set(w2a)
    w2_bd = w2_bd.at[hidden:, hidden:].set(w2b)
    b2_f = jnp.concatenate([b2a, b2b], axis=1)

    # Fused head: [2H, 2] (column 0 -> q1, column 1 -> q2) + [1, 2] bias.
    w3_f = jnp.zeros((h2, 2), jnp.float32)
    w3_f = w3_f.at[:hidden, 0:1].set(w3a)
    w3_f = w3_f.at[hidden:, 1:2].set(w3b)
    b3_f = jnp.concatenate([b3a, b3b], axis=1)

    # Main buffer rows: [w2_bd (2H) | w1_state (state_dim) | w1_act (1) | b1 (1) | b2 (1)]
    w_main = jnp.concatenate([w2_bd, w1s, w1act, b1_f, b2_f], axis=0)  # [2H+state_dim+3, 2H]
    w_head = jnp.concatenate([w3_f, b3_f], axis=0)                     # [2H+1, 2]
    return w_main, w_head


def critic_reference(state, action, params1, params2):
    """Pure-JAX reference matching the original (unfused) torch module."""
    x = jnp.concatenate([state, action], axis=1)

    def mlp(p):
        w1, b1, w2, b2, w3, b3 = p
        h = jnp.maximum(x @ w1 + b1, 0.0)
        h = jnp.maximum(h @ w2 + b2, 0.0)
        return h @ w3 + b3

    return mlp(params1), mlp(params2)


if __name__ == "__main__":
    key = jax.random.PRNGKey(0)
    k_params, k_state, k_action = jax.random.split(key, 3)

    batch = 8
    state_dim = 16
    action_dim = 1  # the torch forward concatenates a single action column

    params1, params2 = init_critic_params(k_params, state_dim)
    w_main, w_head = pack_critic_params(params1, params2, state_dim)

    state = jax.random.normal(k_state, (batch, state_dim), jnp.float32)
    action = jax.random.normal(k_action, (batch, action_dim), jnp.float32)

    q1, q2 = critic_forward(state, action, w_main, w_head)
    q1 = jax.block_until_ready(q1)
    q2 = jax.block_until_ready(q2)

    r1, r2 = critic_reference(state, action, params1, params2)
    assert q1.shape == (batch, 1) and q2.shape == (batch, 1)
    assert jnp.allclose(q1, r1, atol=1e-5, rtol=1e-5)
    assert jnp.allclose(q2, r2, atol=1e-5, rtol=1e-5)

    print("KERNEL_OK")
</pallas_src>

<mosaic_0001>
module attributes {stable_mosaic.version = 11 : i64} {
  func.func @kernel(%arg0: memref<8x16xf32, #tpu.memory_space<vmem>>, %arg1: memref<8x1xf32, #tpu.memory_space<vmem>>, %arg2: memref<275x256xf32, #tpu.memory_space<vmem>>, %arg3: memref<257x2xf32, #tpu.memory_space<vmem>>, %arg4: memref<8x2xf32, #tpu.memory_space<vmem>>) attributes {dimension_semantics = [], scalar_prefetch = 0 : i64, scratch_operands = 0 : i64, tpu.core_type = #tpu.core_type<tc>} {
    %c0 = arith.constant 0 : index
    %c0_0 = arith.constant 0 : index
    %0 = vector.load %arg0[%c0, %c0_0] : memref<8x16xf32, #tpu.memory_space<vmem>>, vector<8x16xf32>
    %c0_1 = arith.constant 0 : index
    %c0_2 = arith.constant 0 : index
    %1 = vector.load %arg1[%c0_1, %c0_2] : memref<8x1xf32, #tpu.memory_space<vmem>>, vector<8x1xf32>
    %c256 = arith.constant 256 : index
    %c0_3 = arith.constant 0 : index
    %2 = vector.load %arg2[%c256, %c0_3] : memref<275x256xf32, #tpu.memory_space<vmem>>, vector<16x256xf32>
    %c272 = arith.constant 272 : index
    %c0_4 = arith.constant 0 : index
    %3 = vector.load %arg2[%c272, %c0_4] : memref<275x256xf32, #tpu.memory_space<vmem>>, vector<1x256xf32>
    %c273 = arith.constant 273 : index
    %c0_5 = arith.constant 0 : index
    %4 = vector.load %arg2[%c273, %c0_5] : memref<275x256xf32, #tpu.memory_space<vmem>>, vector<1x256xf32>
    %c0_6 = arith.constant 0 : index
    %c0_7 = arith.constant 0 : index
    %5 = vector.load %arg2[%c0_6, %c0_7] : memref<275x256xf32, #tpu.memory_space<vmem>>, vector<256x256xf32>
    %c274 = arith.constant 274 : index
    %c0_8 = arith.constant 0 : index
    %6 = vector.load %arg2[%c274, %c0_8] : memref<275x256xf32, #tpu.memory_space<vmem>>, vector<1x256xf32>
    %c0_9 = arith.constant 0 : index
    %c0_10 = arith.constant 0 : index
    %7 = vector.load %arg3[%c0_9, %c0_10] : memref<257x2xf32, #tpu.memory_space<vmem>>, vector<256x2xf32>
    %c256_11 = arith.constant 256 : index
    %c0_12 = arith.constant 0 : index
    %8 = vector.load %arg3[%c256_11, %c0_12] : memref<257x2xf32, #tpu.memory_space<vmem>>, vector<1x2xf32>
    %cst = arith.constant dense<0.000000e+00> : vector<8x256xf32>
    %9 = tpu.matmul %0, %2, %cst {dimension_numbers = #tpu.dot_dimension_numbers<[1], [0], [0], [1], [0, 0, 1, 1], [], []>} : vector<8x16xf32>, vector<16x256xf32>, vector<8x256xf32> -> vector<8x256xf32>
    %10 = vector.broadcast %1 : vector<8x1xf32> to vector<8x256xf32>
    %11 = vector.broadcast %3 : vector<1x256xf32> to vector<8x256xf32>
    %12 = arith.mulf %10, %11 : vector<8x256xf32>
    %13 = arith.addf %9, %12 : vector<8x256xf32>
    %14 = vector.broadcast %4 : vector<1x256xf32> to vector<8x256xf32>
    %15 = arith.addf %13, %14 : vector<8x256xf32>
    %cst_13 = arith.constant 0.000000e+00 : f32
    %16 = vector.broadcast %cst_13 : f32 to vector<8x256xf32>
    %17 = arith.maximumf %15, %16 : vector<8x256xf32>
    %cst_14 = arith.constant dense<0.000000e+00> : vector<8x256xf32>
    %18 = tpu.matmul %17, %5, %cst_14 {dimension_numbers = #tpu.dot_dimension_numbers<[1], [0], [0], [1], [0, 0, 1, 1], [], []>} : vector<8x256xf32>, vector<256x256xf32>, vector<8x256xf32> -> vector<8x256xf32>
    %19 = vector.broadcast %6 : vector<1x256xf32> to vector<8x256xf32>
    %20 = arith.addf %18, %19 : vector<8x256xf32>
    %cst_15 = arith.constant 0.000000e+00 : f32
    %21 = vector.broadcast %cst_15 : f32 to vector<8x256xf32>
    %22 = arith.maximumf %20, %21 : vector<8x256xf32>
    %cst_16 = arith.constant dense<0.000000e+00> : vector<8x2xf32>
    %23 = tpu.matmul %22, %7, %cst_16 {dimension_numbers = #tpu.dot_dimension_numbers<[1], [0], [0], [1], [0, 0, 1, 1], [], []>} : vector<8x256xf32>, vector<256x2xf32>, vector<8x2xf32> -> vector<8x2xf32>
    %24 = vector.broadcast %8 : vector<1x2xf32> to vector<8x2xf32>
    %25 = arith.addf %23, %24 : vector<8x2xf32>
    %c0_17 = arith.constant 0 : index
    %c0_18 = arith.constant 0 : index
    %26 = vector.load %arg4[%c0_17, %c0_18] : memref<8x2xf32, #tpu.memory_space<vmem>>, vector<8x2xf32>
    tpu.vector_store %arg4[%c0_17, %c0_18], %25 {strides = array<i32>} : memref<8x2xf32, #tpu.memory_space<vmem>>, vector<8x2xf32>,
    return
  }
}

</mosaic_0001>

<bundles_post_ra>
// kernel: critic_forward.1
= control target key start
LH: loop header
LB: loop body
LE: loop exit
PB: predicated region body
PF: predicated region fallthrough
CT: control target
= control target key end

     0   :  { %9 = vsyncpa [#allocation3], 0  ;;  %s580_s15 = smov [#allocation2]   ;;  %s730_s0 = inlined_call_operand.vmem [shape: f32[8,16], index: 0, kind: input, shape index: {}]   ;;  %s731_s1 = inlined_call_operand.vmem [shape: f32[8,1], index: 1, kind: input, shape index: {}]   ;;  %s732_s2 = inlined_call_operand.hbm [shape: f32[275,256], index: 2, kind: input, shape index: {}]   ;;  %s733_s3 = inlined_call_operand.vmem [shape: f32[257,2], index: 3, kind: input, shape index: {}]   ;;  %s734_s4 = inlined_call_operand.vmem [shape: f32[8,2], index: 4, kind: output, shape index: {}]  }
   0x1   :  { %s19_s16 = sshll.u32 %s580_s15, 4  ;;  %s556_s19 = scalar_lea.hbm %s732_s2, 8960  ;;  %s20_s16 = int_to_ptr.vmem [resolvable:$true] %s19_s16 }
   0x2   :  { %p557_p0 = scmp.ne.s32.totalorder %s732_s2, %s556_s19  ;;  %p560_p1 = scmp.lt.u32.totalorder %s556_s19, %s732_s2 }
   0x4   :  { %p562_p2 = pnand %p560_p1, %p557_p0 }
   0x6   :  { %565 = shalt.err (!%p562_p2)
}
   0x7   :  { %s566_s24 = scalar_lea.vmem %s20_s16, 8960  ;;  %p571_p4 = scmp.lt.s32.totalorder %s20_s16, %s20_s16 }
   0x8   :  { %p567_p3 = scmp.ne.s32.totalorder %s20_s16, %s566_s24  ;;  %p572_p5 = scmp.lt.s32.totalorder %s566_s24, %s566_s24 }
   0xa   :  { %p573_p6 = por %p572_p5, %p571_p4 }
   0xc   :  { %p574_p7 = pnand %p573_p6, %p567_p3 }
   0xe   :  { %577 = shalt.err (!%p574_p7)
}
   0xf   :  { %s581_s25 = smov 256   ;;  %s582_s26 = smov 16  }
  0x10   :  { %25 = dma.hbm_to_vmem [thread:$0]  %s732_s2, 8960, %s20_s16, [#allocation3], %s581_s25, %s581_s25, %s582_s26  }
  0x11   :  { %578 = dma.done.wait [#allocation3], 8960  }
  0x12   :  { %579 = vsyncadd [#allocation3], 4294958336  ;;  %v583_v0 = vmov 0.0   ;;  %v584_v1 = vmov 0   ;;  %v34_v2 = vld [vmem:[#allocation2 + $0x208] sm:$0xff]  ;;  %v36_v3 = vld [vmem:[#allocation2 + $0x218] sm:$0xff] }
  0x13   :  { %226 = vmatprep.mubr.f32.mxu0 %v583_v0  ;;  %555 = vset.pattern.permute.xlu0 %v584_v1  ;;  %v33_v4 = vld [vmem:[#allocation2 + $0x200] sm:$0xff]  ;;  %v450_v5 = vpack.c.bf16 %v36_v3, %v34_v2  ;;  %v35_v6 = vld [vmem:[#allocation2 + $0x210] sm:$0xff]  ;;  %v42_v10 = vld [vmem:[#allocation2 + $0x8] sm:$0xff]  ;;  %vm158_vm0 = vcmask 130048   ;;  %vm406_vm1 = vcmask 15360  }
  0x14   :  { %v32_v7 = vld [vmem:[%s731_s1] sm:$0xff]  ;;  %v452_v8 = vpack.c.bf16 %v35_v6, %v33_v4  ;;  %v44_v11 = vld [vmem:[#allocation2 + $0x18] sm:$0xff]  ;;  %v43_v14 = vld [vmem:[#allocation2 + $0x10] sm:$0xff] }
  0x15   :  { %v31_v9 = vld [vmem:[%s730_s0] sm:$0xff]  ;;  %142 = vperm.xlu0 %555, %v32_v7   ;;  %451 = vmatprep.subr.bf16.mxu0 %v450_v5  ;;  %v454_v13 = vpack.c.bf16 %v44_v11, %v42_v10  ;;  %v46_v15 = vld [vmem:[#allocation2 + $0x28] sm:$0xff]  ;;  %v48_v16 = vld [vmem:[#allocation2 + $0x38] sm:$0xff] }
  0x16   :  { %v41_v12 = vld [vmem:[#allocation2] sm:$0xff]  ;;  %453 = vmatpush1.bf16.msra.mxu0 %v452_v8  ;;  %v458_v18 = vpack.c.bf16 %v48_v16, %v46_v15  ;;  %v47_v20 = vld [vmem:[#allocation2 + $0x30] sm:$0xff]  ;;  %v50_v21 = vld [vmem:[#allocation2 + $0x48] sm:$0xff] }
  0x17   :  { %v456_v17 = vpack.c.bf16 %v43_v14, %v41_v12  ;;  %v45_v19 = vld [vmem:[#allocation2 + $0x20] sm:$0xff]  ;;  %455 = vmatprep.subr.bf16.mxu1 %v454_v13  ;;  %v52_v22 = vld [vmem:[#allocation2 + $0x58] sm:$0xff]  ;;  %v51_v26 = vld [vmem:[#allocation2 + $0x50] sm:$0xff] }
  0x18   :  { %v460_v23 = vpack.c.bf16 %v47_v20, %v45_v19  ;;  %v462_v24 = vpack.c.bf16 %v52_v22, %v50_v21  ;;  %v49_v25 = vld [vmem:[#allocation2 + $0x40] sm:$0xff]  ;;  %v54_v27 = vld [vmem:[#allocation2 + $0x68] sm:$0xff]  ;;  %v56_v28 = vld [vmem:[#allocation2 + $0x78] sm:$0xff] }
  0x19   :  { %457 = vmatpush1.bf16.msra.mxu1 %v456_v17  ;;  %413 = vmatmul.mubr.msk.f32.vlgmr.msra.gmra.mrb[0].mxu0 %vm158_vm0, %v31_v9  ;;  %v464_v29 = vpack.c.bf16 %v51_v26, %v49_v25  ;;  %v466_v30 = vpack.c.bf16 %v56_v28, %v54_v27  ;;  %v53_v31 = vld [vmem:[#allocation2 + $0x60] sm:$0xff]  ;;  %v55_v32 = vld [vmem:[#allocation2 + $0x70] sm:$0xff]  ;;  %v58_v33 = vld [vmem:[#allocation2 + $0x88] sm:$0xff] }
  0x1a   :  { %459 = vmatprep.subr.bf16.mxu1 %v458_v18  ;;  %v60_v34 = vld [vmem:[#allocation2 + $0x98] sm:$0xff]  ;;  %v468_v35 = vpack.c.bf16 %v55_v32, %v53_v31  ;;  %v57_v37 = vld [vmem:[#allocation2 + $0x80] sm:$0xff]  ;;  %v59_v38 = vld [vmem:[#allocation2 + $0x90] sm:$0xff] }
  0x1b   :  { %v470_v36 = vpack.c.bf16 %v60_v34, %v58_v33  ;;  %v62_v39 = vld [vmem:[#allocation2 + $0xa8] sm:$0xff]  ;;  %v64_v40 = vld [vmem:[#allocation2 + $0xb8] sm:$0xff]  ;;  %v472_v41 = vpack.c.bf16 %v59_v38, %v57_v37  ;;  %v61_v43 = vld [vmem:[#allocation2 + $0xa0] sm:$0xff] }
  0x1c   :  { %v474_v42 = vpack.c.bf16 %v64_v40, %v62_v39  ;;  %v63_v44 = vld [vmem:[#allocation2 + $0xb0] sm:$0xff]  ;;  %v66_v45 = vld [vmem:[#allocation2 + $0xc8] sm:$0xff]  ;;  %v68_v46 = vld [vmem:[#allocation2 + $0xd8] sm:$0xff] }
  0x1d   :  { %461 = vmatpush1.bf16.msra.mxu1 %v460_v23  ;;  %v476_v47 = vpack.c.bf16 %v63_v44, %v61_v43  ;;  %v478_v48 = vpack.c.bf16 %v68_v46, %v66_v45  ;;  %v65_v49 = vld [vmem:[#allocation2 + $0xc0] sm:$0xff]  ;;  %v67_v50 = vld [vmem:[#allocation2 + $0xd0] sm:$0xff]  ;;  %v70_v51 = vld [vmem:[#allocation2 + $0xe8] sm:$0xff] }
  0x1e   :  { %463 = vmatprep.subr.bf16.mxu1 %v462_v24  ;;  %v72_v52 = vld [vmem:[#allocation2 + $0xf8] sm:$0xff]  ;;  %v480_v53 = vpack.c.bf16 %v67_v50, %v65_v49  ;;  %v69_v55 = vld [vmem:[#allocation2 + $0xe0] sm:$0xff]  ;;  %v71_v56 = vld [vmem:[#allocation2 + $0xf0] sm:$0xff] }
  0x1f   :  { %v482_v54 = vpack.c.bf16 %v72_v52, %v70_v51  ;;  %v74_v57 = vld [vmem:[#allocation2 + $0x108] sm:$0xff]  ;;  %v76_v58 = vld [vmem:[#allocation2 + $0x118] sm:$0xff]  ;;  %v484_v59 = vpack.c.bf16 %v71_v56, %v69_v55  ;;  %v73_v61 = vld [vmem:[#allocation2 + $0x100] sm:$0xff] }
  0x20   :  { %v486_v60 = vpack.c.bf16 %v76_v58, %v74_v57  ;;  %v75_v62 = vld [vmem:[#allocation2 + $0x110] sm:$0xff]  ;;  %v78_v63 = vld [vmem:[#allocation2 + $0x128] sm:$0xff]  ;;  %v80_v0 = vld [vmem:[#allocation2 + $0x138] sm:$0xff] }
  0x21   :  { %465 = vmatpush1.bf16.msra.mxu1 %v464_v29  ;;  %v488_v1 = vpack.c.bf16 %v75_v62, %v73_v61  ;;  %v490_v2 = vpack.c.bf16 %v80_v0, %v78_v63  ;;  %v77_v3 = vld [vmem:[#allocation2 + $0x120] sm:$0xff]  ;;  %v79_v4 = vld [vmem:[#allocation2 + $0x130] sm:$0xff]  ;;  %v82_v5 = vld [vmem:[#allocation2 + $0x148] sm:$0xff] }
  0x22   :  { %467 = vmatprep.subr.bf16.mxu1 %v466_v30  ;;  %v84_v6 = vld [vmem:[#allocation2 + $0x158] sm:$0xff]  ;;  %v492_v7 = vpack.c.bf16 %v79_v4, %v77_v3  ;;  %v81_v9 = vld [vmem:[#allocation2 + $0x140] sm:$0xff]  ;;  %v83_v10 = vld [vmem:[#allocation2 + $0x150] sm:$0xff] }
  0x23   :  { %v494_v8 = vpack.c.bf16 %v84_v6, %v82_v5  ;;  %v86_v11 = vld [vmem:[#allocation2 + $0x168] sm:$0xff]  ;;  %v88_v12 = vld [vmem:[#allocation2 + $0x178] sm:$0xff]  ;;  %v496_v13 = vpack.c.bf16 %v83_v10, %v81_v9  ;;  %v85_v15 = vld [vmem:[#allocation2 + $0x160] sm:$0xff] }
  0x24   :  { %v498_v14 = vpack.c.bf16 %v88_v12, %v86_v11  ;;  %v87_v16 = vld [vmem:[#allocation2 + $0x170] sm:$0xff]  ;;  %v90_v17 = vld [vmem:[#allocation2 + $0x188] sm:$0xff]  ;;  %v92_v18 = vld [vmem:[#allocation2 + $0x198] sm:$0xff] }
  0x25   :  { %469 = vmatpush1.bf16.msra.mxu1 %v468_v35  ;;  %v500_v19 = vpack.c.bf16 %v87_v16, %v85_v15  ;;  %v502_v20 = vpack.c.bf16 %v92_v18, %v90_v17  ;;  %v89_v21 = vld [vmem:[#allocation2 + $0x180] sm:$0xff]  ;;  %v91_v22 = vld [vmem:[#allocation2 + $0x190] sm:$0xff]  ;;  %v94_v23 = vld [vmem:[#allocation2 + $0x1a8] sm:$0xff]  ;;  %v146_v17 = vlaneseq }
  0x26   :  { %471 = vmatprep.subr.bf16.mxu1 %v470_v36  ;;  %v96_v24 = vld [vmem:[#allocation2 + $0x1b8] sm:$0xff]  ;;  %v504_v25 = vpack.c.bf16 %v91_v22, %v89_v21  ;;  %v93_v27 = vld [vmem:[#allocation2 + $0x1a0] sm:$0xff]  ;;  %v95_v28 = vld [vmem:[#allocation2 + $0x1b0] sm:$0xff] }
  0x27   :  { %v506_v26 = vpack.c.bf16 %v96_v24, %v94_v23  ;;  %v508_v29 = vpack.c.bf16 %v95_v28, %v93_v27  ;;  %v98_v30 = vld [vmem:[#allocation2 + $0x1c8] sm:$0xff]  ;;  %v100_v31 = vld [vmem:[#allocation2 + $0x1d8] sm:$0xff]  ;;  %v97_v33 = vld [vmem:[#allocation2 + $0x1c0] sm:$0xff]  ;;  %v147_v18 = vshrl.u32 %v146_v17, 7 }
  0x28   :  { %v510_v32 = vpack.c.bf16 %v100_v31, %v98_v30  ;;  %v99_v34 = vld [vmem:[#allocation2 + $0x1d0] sm:$0xff]  ;;  %v102_v36 = vld [vmem:[#allocation2 + $0x1e8] sm:$0xff]  ;;  %v104_v37 = vld [vmem:[#allocation2 + $0x1f8] sm:$0xff] }
  0x29   :  { %473 = vmatpush1.bf16.msra.mxu1 %v472_v41  ;;  %v512_v35 = vpack.c.bf16 %v99_v34, %v97_v33  ;;  %v514_v38 = vpack.c.bf16 %v104_v37, %v102_v36  ;;  %v101_v39 = vld [vmem:[#allocation2 + $0x1e0] sm:$0xff]  ;;  %v103_v40 = vld [vmem:[#allocation2 + $0x1f0] sm:$0xff]  ;;  %v124_v43 = vld [vmem:[%s733_s3 + $0x88] sm:$0xff]  ;;  %v152_v21 = vsub.s32 1, %v147_v18 }
  0x2a   :  { %475 = vmatprep.subr.bf16.mxu1 %v474_v42  ;;  %v516_v41 = vpack.c.bf16 %v103_v40, %v101_v39  ;;  %v123_v42 = vld [vmem:[%s733_s3 + $0x80] sm:$0xff]  ;;  %v108_v46 = vld [vmem:[%s733_s3 + $0x8] sm:$0xff]  ;;  %v109_v51 = vld [vmem:[%s733_s3 + $0x10] sm:$0xff] }
  0x2b   :  { %v107_v44 = vld [vmem:[%s733_s3] sm:$0xff]  ;;  %v518_v45 = vpack.c.bf16 %v124_v43, %v123_v42  ;;  %v110_v52 = vld [vmem:[%s733_s3 + $0x18] sm:$0xff]  ;;  %v112_v58 = vld [vmem:[%s733_s3 + $0x28] sm:$0xff] }
  0x2c   :  { %v520_v49 = vpack.c.bf16 %v108_v46, %v107_v44  ;;  %v524_v55 = vpack.c.bf16 %v110_v52, %v109_v51  ;;  %v111_v57 = vld [vmem:[%s733_s3 + $0x20] sm:$0xff]  ;;  %v113_v63 = vld [vmem:[%s733_s3 + $0x30] sm:$0xff]  ;;  %v114_v0 = vld [vmem:[%s733_s3 + $0x38] sm:$0xff] }
  0x2d   :  { %477 = vmatpush1.bf16.msra.mxu1 %v476_v47  ;;  %v125_v47 = vld [vmem:[%s733_s3 + $0x90] sm:$0xff]  ;;  %519 = vmatprep.subr.bf16.mxu0 %v518_v45  ;;  %v528_v61 = vpack.c.bf16 %v112_v58, %v111_v57  ;;  %v532_v3 = vpack.c.bf16 %v114_v0, %v113_v63  ;;  %v115_v5 = vld [vmem:[%s733_s3 + $0x40] sm:$0xff]  ;;  %v116_v6 = vld [vmem:[%s733_s3 + $0x48] sm:$0xff] }
  0x2e   :  { %479 = vmatprep.subr.bf16.mxu1 %v478_v48  ;;  %v126_v48 = vld [vmem:[%s733_s3 + $0x98] sm:$0xff]  ;;  %521 = vmatpush3.bf16.msra.mxu0 %v520_v49  ;;  %v536_v9 = vpack.c.bf16 %v116_v6, %v115_v5  ;;  %v117_v11 = vld [vmem:[%s733_s3 + $0x50] sm:$0xff]  ;;  %v120_v39 = vld [vmem:[%s733_s3 + $0x68] sm:$0xff] }
  0x2f   :  { %v522_v50 = vpack.c.bf16 %v126_v48, %v125_v47  ;;  %v118_v12 = vld [vmem:[%s733_s3 + $0x58] sm:$0xff]  ;;  %v121_v44 = vld [vmem:[%s733_s3 + $0x70] sm:$0xff]  ;;  %v106_v47 = vld [vmem:[#allocation2 + $0x222] ss:$8 sm:$0x3] }
  0x30   :  { %v540_v15 = vpack.c.bf16 %v118_v12, %v117_v11  ;;  %v138_v42 = vld [vmem:[%s733_s3 + $0xf8] sm:$0xff]  ;;  %v256_v49 = vrot.slane %v106_v47, %v152_v21  ;;  %v414_v57 = vld [vmem:[%s733_s3 + $0x100] ss:$0 sm:$0xff] }
  0x31   :  { %481 = vmatpush1.bf16.msra.mxu1 %v480_v53  ;;  %v127_v53 = vld [vmem:[%s733_s3 + $0xa0] sm:$0xff]  ;;  %523 = vmatprep.subr.bf16.mxu0 %v522_v50  ;;  %v122_v45 = vld [vmem:[%s733_s3 + $0x78] sm:$0xff] }
  0x32   :  { %483 = vmatprep.subr.bf16.mxu1 %v482_v54  ;;  %v128_v54 = vld [vmem:[%s733_s3 + $0xa8] sm:$0xff]  ;;  %525 = vmatpush3.bf16.msra.mxu0 %v524_v55  ;;  %v548_v46 = vpack.c.bf16 %v122_v45, %v121_v44 }
  0x33   :  { %v526_v56 = vpack.c.bf16 %v128_v54, %v127_v53 }
  0x35   :  { %485 = vmatpush1.bf16.msra.mxu1 %v484_v59  ;;  %v129_v59 = vld [vmem:[%s733_s3 + $0xb0] sm:$0xff]  ;;  %527 = vmatprep.subr.bf16.mxu0 %v526_v56 }
  0x36   :  { %487 = vmatprep.subr.bf16.mxu1 %v486_v60  ;;  %v130_v60 = vld [vmem:[%s733_s3 + $0xb8] sm:$0xff]  ;;  %529 = vmatpush3.bf16.msra.mxu0 %v528_v61 }
  0x37   :  { %v530_v62 = vpack.c.bf16 %v130_v60, %v129_v59 }
  0x39   :  { %489 = vmatpush1.bf16.msra.mxu1 %v488_v1  ;;  %v131_v1 = vld [vmem:[%s733_s3 + $0xc0] sm:$0xff]  ;;  %531 = vmatprep.subr.bf16.mxu0 %v530_v62 }
  0x3a   :  { %491 = vmatprep.subr.bf16.mxu1 %v490_v2  ;;  %v132_v2 = vld [vmem:[%s733_s3 + $0xc8] sm:$0xff]  ;;  %533 = vmatpush3.bf16.msra.mxu0 %v532_v3 }
  0x3b   :  { %v534_v4 = vpack.c.bf16 %v132_v2, %v131_v1 }
  0x3d   :  { %493 = vmatpush1.bf16.msra.mxu1 %v492_v7  ;;  %v133_v7 = vld [vmem:[%s733_s3 + $0xd0] sm:$0xff]  ;;  %535 = vmatprep.subr.bf16.mxu0 %v534_v4 }
  0x3e   :  { %495 = vmatprep.subr.bf16.mxu1 %v494_v8  ;;  %v134_v8 = vld [vmem:[%s733_s3 + $0xd8] sm:$0xff]  ;;  %537 = vmatpush3.bf16.msra.mxu0 %v536_v9 }
  0x3f   :  { %v538_v10 = vpack.c.bf16 %v134_v8, %v133_v7 }
  0x41   :  { %497 = vmatpush1.bf16.msra.mxu1 %v496_v13  ;;  %v135_v13 = vld [vmem:[%s733_s3 + $0xe0] sm:$0xff]  ;;  %539 = vmatprep.subr.bf16.mxu0 %v538_v10 }
  0x42   :  { %499 = vmatprep.subr.bf16.mxu1 %v498_v14  ;;  %v136_v14 = vld [vmem:[%s733_s3 + $0xe8] sm:$0xff]  ;;  %541 = vmatpush3.bf16.msra.mxu0 %v540_v15 }
  0x43   :  { %v542_v16 = vpack.c.bf16 %v136_v14, %v135_v13 }
  0x45   :  { %501 = vmatpush1.bf16.msra.mxu1 %v500_v19  ;;  %543 = vmatprep.subr.bf16.mxu0 %v542_v16  ;;  %v148_v19 = vsub.s32 0, %v147_v18 }
  0x46   :  { %503 = vmatprep.subr.bf16.mxu1 %v502_v20  ;;  %v38_v20 = vld [vmem:[#allocation2 + $0x220] ss:$8 sm:$0x3] }
  0x47   :  { %v149_v22 = vrot.slane %v38_v20, %v148_v19  ;;  %v153_v23 = vrot.slane %v38_v20, %v152_v21  ;;  %v252_v48 = vrot.slane %v106_v47, %v148_v19 }
  0x49   :  { %505 = vmatpush1.bf16.msra.mxu1 %v504_v25  ;;  %v40_v25 = vld [vmem:[#allocation2 + $0x221] ss:$8 sm:$0x3] }
  0x4a   :  { %507 = vmatprep.subr.bf16.mxu1 %v506_v26  ;;  %v237_v28 = vrot.slane %v40_v25, %v148_v19  ;;  %v241_v30 = vrot.slane %v40_v25, %v152_v21 }
  0x4d   :  { %509 = vmatpush1.bf16.msra.mxu1 %v508_v29 }
  0x4e   :  { %511 = vmatprep.subr.bf16.mxu1 %v510_v32 }
  0x51   :  { %513 = vmatpush1.bf16.msra.mxu1 %v512_v35 }
  0x52   :  { %515 = vmatprep.subr.bf16.mxu1 %v514_v38  ;;  %v119_v38 = vld [vmem:[%s733_s3 + $0x60] sm:$0xff] }
  0x53   :  { %v544_v40 = vpack.c.bf16 %v120_v39, %v119_v38 }
  0x55   :  { %517 = vmatpush1.bf16.msra.mxu1 %v516_v41  ;;  %545 = vmatpush3.bf16.msra.mxu0 %v544_v40  ;;  %v137_v41 = vld [vmem:[%s733_s3 + $0xf0] sm:$0xff] }
  0x56   :  { %v546_v43 = vpack.c.bf16 %v138_v42, %v137_v41 }
  0x58   :  { %547 = vmatprep.subr.bf16.mxu0 %v546_v43 }
  0x59   :  { %549 = vmatpush3.bf16.msra.mxu0 %v548_v46 }
  0x94   :  { %v143_v24 = vpop.permute.xlu0 %142 }
  0x95   :  { %v156_v26 = vmul.f32 %v149_v22, %v143_v24  ;;  %v157_v27 = vmul.f32 %v153_v23, %v143_v24 }
  0xec   :  { %v228_v29 = vpop.f32.mrb[0].mxu0 }
  0xed   :  { %v229_v31 = vadd.f32 %v228_v29, %v156_v26  ;;  %v230_v32 = vpop.f32.mrb[1].mxu0 }
  0xee   :  { %v231_v33 = vadd.f32 %v230_v32, %v157_v27 }
  0xef   :  { %v244_v34 = vadd.f32 %v237_v28, %v229_v31 }
  0xf0   :  { %v245_v35 = vadd.f32 %v241_v30, %v231_v33 }
  0xf1   :  { %v246_v37 = vmax.f32 %v244_v34, 0.0 }
  0xf2   :  { %v247_v36 = vmax.f32 %v245_v35, 0.0 }
  0xf4   :  { %323 = vmatprep.mubr.f32.mxu1 %v247_v36 }
  0xf5   :  { %324 = vmatmul.mubr.f32.vlgmr.msra.gmra.mrb[0].mxu1 %v246_v37 }
 0x1c8   :  { %v325_v50 = vpop.f32.mrb[0].mxu1 }
 0x1c9   :  { %v326_v51 = vadd.f32 %v325_v50, %v252_v48  ;;  %v327_v52 = vpop.f32.mrb[1].mxu1 }
 0x1ca   :  { %v328_v53 = vadd.f32 %v327_v52, %v256_v49 }
 0x1cb   :  { %v330_v55 = vmax.f32 %v326_v51, 0.0 }
 0x1cc   :  { %v331_v54 = vmax.f32 %v328_v53, 0.0 }
 0x1ce   :  { %400 = vmatprep.mubr.f32.mxu0 %v331_v54 }
 0x1cf   :  { %401 = vmatmul.mubr.f32.vlgmr.msra.gmra.mrb[2].mxu0 %v330_v55 }
 0x2a2   :  { %v447_v56 = vpop.f32.mrb[2].mxu0 }
 0x2a3   :  { %v448_v58 = vpop.f32.mrb[3].mxu0 }
 0x2a4   :  { %v449_v59 = vadd.f32 %v448_v58, %v447_v56 }
 0x2a6   :  { %v403_v60 = vadd.f32 %v449_v59, %v414_v57 }
 0x2a8   :  { %407 = vst.msk [vmem:[%s734_s4] sm:$0xff] %vm406_vm1, %v403_v60 }
 0x2a9   :  { %412 = vsyncpa [#allocation3], 1 }

</bundles_post_ra>
